<compile_context>
chip_gen: v6e
topology: v6e:2x2x1
jax: 0.10.0
libtpu: 0.0.40
codegen_flags: <defaults>
</compile_context>

<pallas_src>
import jax
import jax.numpy as jnp
from jax.experimental import pallas as pl
from jax.experimental.pallas import tpu as pltpu


def _round_up(a, m):
    return -(-a // m) * m


def _embed_kernel(p_ref, w_ref, posb_ref, out_ref):
    # p_ref:    (1, K, TILE_N)      bf16  one batch row of flattened patches^T
    # w_ref:    (C_pad, K)          bf16  flattened conv weight (constant block)
    # posb_ref: (C_pad, TILE_N)     f32   (position embeddings + conv bias)^T
    # out_ref:  (1, C_pad, TILE_N)  f32
    y = jnp.dot(w_ref[...], p_ref[0],
                preferred_element_type=jnp.float32)      # MXU, f32 accumulate
    out_ref[0] = y + posb_ref[...]                       # f32 epilogue add


def embeddings_forward(x, conv_w, conv_b, pos_emb, patch_size, *, tile_n=512):
    """x: (B, C, H, W) NCHW float32.  Returns (B, N, C_out) float32."""
    if x is None:
        return None

    B, C, H, W = x.shape
    P = patch_size
    C_out = conv_w.shape[0]
    nH, nW = H // P, W // P
    N = nH * nW
    K = C * P * P

    # --- tiling / padding choices ---------------------------------------------
    tile_n = max(128, (tile_n // 128) * 128)        # lane-dense tile over N
    tile_n = min(tile_n, _round_up(N, 128))
    N_pad = _round_up(N, tile_n)
    C_pad = _round_up(C_out, 8)                     # sublane granule only

    # --- glue (plain JAX) ------------------------------------------------------
    # patches^T: (B, K, N) with K flattened in [c, kh, kw] order (matches the
    # PyTorch Conv2d weight layout) and N flattened in [nh, nw] order.
    patches = x.reshape(B, C, nH, P, nW, P).transpose(0, 1, 3, 5, 2, 4)
    patches = patches.reshape(B, K, N)
    patches = jnp.pad(patches, ((0, 0), (0, 0), (0, N_pad - N)))
    patches = patches.astype(jnp.bfloat16)

    # Conv2d weight (C_out, C_in, P, P) -> (C_pad, K), no transpose needed.
    w_mat = conv_w.reshape(C_out, K)
    w_mat = jnp.pad(w_mat, ((0, C_pad - C_out), (0, 0))).astype(jnp.bfloat16)

    # Fold conv bias into position embeddings; keep transposed + small: (C_pad, N_pad).
    posb = (pos_emb.reshape(N, C_out) + conv_b.reshape(1, C_out)).T      # (C_out, N)
    posb = jnp.pad(posb, ((0, C_pad - C_out), (0, N_pad - N)))           # f32

    # --- hot path in Pallas ----------------------------------------------------
    grid = (B, N_pad // tile_n)
    out = pl.pallas_call(
        _embed_kernel,
        out_shape=jax.ShapeDtypeStruct((B, C_pad, N_pad), jnp.float32),
        grid_spec=pltpu.PrefetchScalarGridSpec(
            num_scalar_prefetch=0,
            grid=grid,
            in_specs=[
                pl.BlockSpec((1, K, tile_n), lambda b, j: (b, 0, j)),
                pl.BlockSpec((C_pad, K), lambda b, j: (0, 0)),
                pl.BlockSpec((C_pad, tile_n), lambda b, j: (0, j)),
            ],
            out_specs=pl.BlockSpec((1, C_pad, tile_n), lambda b, j: (b, 0, j)),
        ),
        compiler_params=pltpu.CompilerParams(
            dimension_semantics=("parallel", "parallel"),
            vmem_limit_bytes=32 * 1024 * 1024,   # real raise only on v5e
        ),
    )(patches, w_mat, posb)

    # (B, C_pad, N_pad) -> (B, N, C_out); the transpose mirrors the module's
    # x.flatten(2).transpose(-1, -2).
    return out[:, :C_out, :N].transpose(0, 2, 1)


def _reference(x, conv_w, conv_b, pos_emb, patch_size):
    """Pure-JAX f32 reference mirroring the PyTorch forward (eval mode)."""
    y = jax.lax.conv_general_dilated(
        x, conv_w,
        window_strides=(patch_size, patch_size),
        padding="VALID",
        dimension_numbers=("NCHW", "OIHW", "NCHW"),
    ) + conv_b.reshape(1, -1, 1, 1)
    B, C_out, nH, nW = y.shape
    y = y.reshape(B, C_out, nH * nW).transpose(0, 2, 1)
    return y + pos_emb                                     # dropout: eval -> identity


if __name__ == "__main__":
    # Small shapes consistent with the module: img 16x16, patch 4, channels 4.
    B, C, H, W = 2, 4, 16, 16
    P = 4
    C_out = C                      # Conv2d(in_channels, in_channels, ...)
    N = (H // P) * (W // P)        # 16 patches

    key = jax.random.PRNGKey(0)
    kx, kw, kb, kp = jax.random.split(key, 4)

    x = jax.random.normal(kx, (B, C, H, W), dtype=jnp.float32)

    fan_in = C * P * P
    bound = 1.0 / (fan_in ** 0.5)
    conv_w = jax.random.uniform(kw, (C_out, C, P, P), jnp.float32, -bound, bound)
    conv_b = jax.random.uniform(kb, (C_out,), jnp.float32, -bound, bound)
    # nn.Parameter(torch.zeros(1, n_patches, in_channels)) — use a small
    # deterministic non-zero value so the in-kernel add is exercised.
    pos_emb = 0.01 * jax.random.normal(kp, (1, N, C_out), dtype=jnp.float32)

    out = embeddings_forward(x, conv_w, conv_b, pos_emb, P)
    out = jax.block_until_ready(out)

    ref = _reference(x, conv_w, conv_b, pos_emb, P)
    assert out.shape == (B, N, C_out), out.shape
    # bf16 matmul operands with f32 accumulation -> relaxed tolerance vs the
    # f32 reference (error ~4e-3 worst case at K=64).
    assert jnp.allclose(out, ref, atol=3e-2, rtol=3e-2), "mismatch vs reference"

    print("KERNEL_OK")
</pallas_src>

<mosaic_0001>
module attributes {stable_mosaic.version = 11 : i64} {
  func.func @_embed_kernel(%arg0: i32, %arg1: i32, %arg2: memref<1x64x128xbf16, #tpu.memory_space<vmem>>, %arg3: memref<8x64xbf16, #tpu.memory_space<vmem>>, %arg4: memref<8x128xf32, #tpu.memory_space<vmem>>, %arg5: memref<1x8x128xf32, #tpu.memory_space<vmem>>) attributes {dimension_semantics = [#tpu.dimension_semantics<parallel>, #tpu.dimension_semantics<parallel>], iteration_bounds = array<i64: 2, 1>, scalar_prefetch = 0 : i64, scratch_operands = 0 : i64, tpu.core_type = #tpu.core_type<tc>, window_params = [{transform_indices = @transform_0, window_bounds = array<i64: 1, 64, 128>}, {pipeline_mode = #tpu.pipeline_mode<synchronous>, transform_indices = @transform_1, window_bounds = array<i64: 8, 64>}, {transform_indices = @transform_2, window_bounds = array<i64: 8, 128>}, {transform_indices = @transform_3, window_bounds = array<i64: 1, 8, 128>}]} {
    %c0 = arith.constant 0 : index
    %c0_0 = arith.constant 0 : index
    %0 = vector.load %arg3[%c0, %c0_0] : memref<8x64xbf16, #tpu.memory_space<vmem>>, vector<8x64xbf16>
    %c0_1 = arith.constant 0 : index
    %c0_2 = arith.constant 0 : index
    %c0_3 = arith.constant 0 : index
    %1 = vector.load %arg2[%c0_1, %c0_2, %c0_3] : memref<1x64x128xbf16, #tpu.memory_space<vmem>>, vector<1x64x128xbf16>
    %2 = vector.shape_cast %1 : vector<1x64x128xbf16> to vector<64x128xbf16>
    %cst = arith.constant dense<0.000000e+00> : vector<8x128xf32>
    %3 = tpu.matmul %0, %2, %cst {dimension_numbers = #tpu.dot_dimension_numbers<[1], [0], [0], [1], [0, 0, 1, 1], [], []>} : vector<8x64xbf16>, vector<64x128xbf16>, vector<8x128xf32> -> vector<8x128xf32>
    %c0_4 = arith.constant 0 : index
    %c0_5 = arith.constant 0 : index
    %4 = vector.load %arg4[%c0_4, %c0_5] : memref<8x128xf32, #tpu.memory_space<vmem>>, vector<8x128xf32>
    %5 = arith.addf %3, %4 : vector<8x128xf32>
    %c0_6 = arith.constant 0 : index
    %c0_7 = arith.constant 0 : index
    %c0_8 = arith.constant 0 : index
    %6 = vector.load %arg5[%c0_6, %c0_7, %c0_8] : memref<1x8x128xf32, #tpu.memory_space<vmem>>, vector<1x8x128xf32>
    %7 = vector.shape_cast %6 : vector<1x8x128xf32> to vector<8x128xf32>
    %8 = vector.shape_cast %5 : vector<8x128xf32> to vector<1x8x128xf32>
    tpu.vector_store %arg5[%c0_6, %c0_7, %c0_8], %8 {strides = array<i32>} : memref<1x8x128xf32, #tpu.memory_space<vmem>>, vector<1x8x128xf32>,
    return
  }
  func.func @transform_0(%arg0: i32, %arg1: i32) -> (i32, i32, i32) {
    %c0_i32 = arith.constant 0 : i32
    %c0_i32_0 = arith.constant 0 : i32
    return %arg0, %c0_i32, %arg1 : i32, i32, i32
  }
  func.func @transform_1(%arg0: i32, %arg1: i32) -> (i32, i32) {
    %c0_i32 = arith.constant 0 : i32
    %c0_i32_0 = arith.constant 0 : i32
    %c0_i32_1 = arith.constant 0 : i32
    return %c0_i32, %c0_i32_0 : i32, i32
  }
  func.func @transform_2(%arg0: i32, %arg1: i32) -> (i32, i32) {
    %c0_i32 = arith.constant 0 : i32
    %c0_i32_0 = arith.constant 0 : i32
    return %c0_i32, %arg1 : i32, i32
  }
  func.func @transform_3(%arg0: i32, %arg1: i32) -> (i32, i32, i32) {
    %c0_i32 = arith.constant 0 : i32
    %c0_i32_0 = arith.constant 0 : i32
    return %arg0, %c0_i32, %arg1 : i32, i32, i32
  }
}

</mosaic_0001>

<bundles_post_ra>
// kernel: tpu_custom_call.1
= control target key start
LH: loop header
LB: loop body
LE: loop exit
PB: predicated region body
PF: predicated region fallthrough
CT: control target
= control target key end

     0   :  { %s948_s0 = inlined_call_operand.hbm [shape: bf16[2,64,128], index: 0, kind: input, shape index: {}]   ;;  %s949_s1 = inlined_call_operand.hbm [shape: bf16[8,64], index: 1, kind: input, shape index: {}]   ;;  %s950_s2 = inlined_call_operand.hbm [shape: f32[8,128], index: 2, kind: input, shape index: {}]   ;;  %s951_s3 = inlined_call_operand.hbm [shape: f32[2,8,128], index: 3, kind: output, shape index: {}]  }
   0x1   :  { %958 = sst [smem:[#allocation12_spill]] %s949_s1 }
   0x2   :  { %8 = vsyncpa [#allocation3], 0 }
   0x3   :  { %10 = vsyncpa [#allocation3 + $0x1], 0 }
   0x4   :  { %11 = vsyncpa [#allocation6], 0 }
   0x5   :  { %12 = vsyncpa [#allocation4], 0 }
   0x6   :  { %14 = vsyncpa [#allocation4 + $0x1], 0  ;;  %s761_s12 = smov 0   ;;  %s763_s13 = smov 0  }
   0x7   :  { %s765_s14 = smov 0   ;;  %s767_s15 = smov 0  }
   0x8   :  { %s769_s16 = smov 0   ;;  %s771_s17 = smov 0  }
   0x9 LB: > { %s435_s18 = sadd.s32 4294967295, %s731_s17   ;;  %s436_s19 = sadd.s32 4294967294, %s731_s17   ;;  %s731_s17 = sphi %s771_s17, %s20_s17   ;;  %s727_s16 = sphi %s769_s16, %s979_s16   ;;  %s723_s15 = sphi %s767_s15, %s978_s15   ;;  %s719_s14 = sphi %s765_s14, %s977_s14   ;;  %s715_s13 = sphi %s763_s13, %s976_s13   ;;  %s711_s12 = sphi %s761_s12, %s975_s12  }
   0xa   : > { %s41_s20 = sadd.s32 1, %s719_s14  ;;  %p48_p0 = scmp.ne.s32.totalorder %s719_s14, %s715_s13 }
   0xb   : > { %p49_p1 = scmp.eq.s32.totalorder %s731_s17, 0  ;;  %p54_p2 = scmp.ne.s32.totalorder %s715_s13, %s711_s12 }
   0xc   : > { %p799_p3 = scmp.eq.s32.totalorder %s435_s18, 0  ;;  %p127_p4 = scmp.eq.s32.totalorder %s435_s18, 1 }
   0xd   : > { %p803_p5 = por %p49_p1, %p48_p0  ;;  %p133_p6 = scmp.eq.s32.totalorder %s436_s19, 1 }
   0xe   : > { %s959_s21 = scalar_select %p799_p3, 1, 0 }
   0xf   : > { %p809_p7 = por %p799_p3, %p54_p2  ;;  %p813_p8 = por %p127_p4, %p48_p0 }
  0x10   : > { %p817_p9 = por %p133_p6, %p54_p2  ;;  %p437_p10 = scmp.ge.s32.totalorder %s731_s17, 1 }
  0x11   : > { %s961_s23 = scalar_select %p809_p7, 1, 0 }
  0x12   : > { %s962_s24 = scalar_select %p813_p8, 1, 0 }
  0x13   : > { %s963_s25 = scalar_select %p817_p9, 1, 0 }
  0x14   : > { %p140_p11 = scmp.lt.s32.totalorder %s731_s17, 3  ;;  %s733_s27 = smov [#allocation5]  }
  0x15   : > { %s153_s28 = sshll.u32 %s733_s27, 4  ;;  %p505_p1 = scmp.lt.s32.totalorder %s731_s17, 2  ;;  %s154_s28 = int_to_ptr.vmem [resolvable:$true] %s153_s28 }
  0x16   : > { %p824_p13 = pnand %p437_p10, %p140_p11  ;;  %s734_s30 = smov [#allocation7]  }
  0x17   : > { %p833_p4 = pnand %p505_p1, %p803_p5  ;;  %s166_s4 = sshll.u32 %s734_s30, 4  ;;  %s167_s4 = int_to_ptr.vmem [resolvable:$true] %s166_s4 }
  0x18   : > { %s964_s26 = scalar_select %p824_p13, 1, 0 }
  0x19   : > { %p488_p0 = pneg %p824_p13  ;;  %s578_s6 = scalar_lea.vmem %s154_s28, 64 }
  0x1a   : > { %s965_s29 = scalar_select %p833_p4, 1, 0 }
  0x1b   : > { %p839_p2 = pnand %p488_p0, %p799_p3  ;;  %p579_p10 = scmp.ne.s32.totalorder %s154_s28, %s578_s6 }
  0x1c   : > { %p586_p1 = scmp.lt.s32.totalorder %s154_s28, %s154_s28  ;;  %p587_p12 = scmp.lt.s32.totalorder %s578_s6, %s578_s6 }
  0x1d   : > { %p569_p6 = pneg %p839_p2 }
  0x1e   : > { %p588_p9 = por %p587_p12, %p586_p1 }
  0x1f   : > { %p581_p5 = pnand %p579_p10, %p569_p6 }
  0x21   : > { %p582_p11 = pneg %p581_p5 }
  0x23   : > { %p589_p8 = pnand %p588_p9, %p582_p11 }
  0x25   : > { %592 = shalt.err (!%p589_p8)
}
  0x26   : > { %s967_s1 = sld [smem:[#allocation12_spill]]  ;;  %s604_s9 = scalar_lea.vmem %s167_s4, 128 }
  0x27   : > { %p605_p0 = scmp.ne.s32.totalorder %s167_s4, %s604_s9  ;;  %p612_p10 = scmp.lt.s32.totalorder %s167_s4, %s167_s4 }
  0x28   : > { %p613_p5 = scmp.lt.s32.totalorder %s604_s9, %s604_s9 }
  0x29   : > { %p607_p3 = pnand %p605_p0, %p569_p6 }
  0x2a   : > { %p614_p13 = por %p613_p5, %p612_p10 }
  0x2b   : > { %p608_p7 = pneg %p607_p3 }
  0x2c   : > { %491 = dma.hbm_to_vmem [thread:$0]  (!%p839_p2), %s967_s1, 64, %s154_s28, [#allocation6]  }
  0x2d   : > { %p615_p4 = pnand %p614_p13, %p608_p7 }
  0x2f   : > { %618 = shalt.err (!%p615_p4)
}
  0x30   : > { %494 = dma.hbm_to_vmem [thread:$0]  (!%p839_p2), %s950_s2, 128, %s167_s4, [#allocation6]  }
  0x31   : > { %s32_s18 = sadd.s32 1, %s727_s16  ;;  %s177_s19 = sand.u32 1, %s719_s14  }
  0x32   : > { %p34_p3 = scmp.ge.s32.totalorder %s32_s18, 2  ;;  %s441_s22 = sshll.u32 %s177_s19, 5 }
  0x33   : > { %s458_s27 = sshll.u32 %s727_s16, 9  ;;  %s181_s7 = scalar_lea.vmem [#allocation2], %s441_s22 }
  0x34   : > { %s981_s18 = smov (%p34_p3, %s32_s18), 0  ;;  %s188_s5 = scalar_lea.hbm %s948_s0, %s458_s27 }
  0x35   : > { %s36_s6 = ssub.s32 %s727_s16, %s981_s18  ;;  %s189_s8 = sshll.u32 %s181_s7, 4  ;;  %s190_s8 = int_to_ptr.vmem [resolvable:$true] %s189_s8 }
  0x36   : > { %p39_p7 = scmp.eq.s32.totalorder %s36_s6, 0  ;;  %s178_s4 = scalar_lea.sflag [#allocation3], %s177_s19 }
  0x37   : > { %p968_p8 = scmp.ne.s32.totalorder %s965_s29, 0  ;;  %s632_s10 = scalar_lea.vmem %s190_s8, 512 }
  0x38   : > { %s874_s9 = scalar_select %p39_p7, %s719_s14, %s41_s20  }
  0x39   : > { %p621_p9 = pneg %p968_p8  ;;  %p633_p12 = scmp.ne.s32.totalorder %s190_s8, %s632_s10 }
  0x3a   : > { %s735_s11 = smov [#allocation2]  }
  0x3b   : > { %p635_p13 = pnand %p633_p12, %p621_p9  ;;  %s637_s1 = sshll.u32 %s735_s11, 4  ;;  %s638_s1 = int_to_ptr.vmem [resolvable:$false] %s637_s1 }
  0x3c   : > { %s639_s28 = scalar_lea.vmem %s638_s1, 1024  ;;  %p640_p2 = scmp.lt.s32.totalorder %s190_s8, %s638_s1 }
  0x3d   : > { %p636_p4 = pneg %p635_p13  ;;  %p641_p6 = scmp.lt.s32.totalorder %s639_s28, %s632_s10 }
  0x3f   : > { %p642_p11 = por %p641_p6, %p640_p2 }
  0x41   : > { %p643_p1 = pnand %p642_p11, %p636_p4 }
  0x43   : > { %646 = shalt.err (!%p643_p1)
}
  0x44   : > { %s736_s22 = smov 64   ;;  %s737_s20 = smov 4  }
  0x45   : > { %498 = dma.hbm_to_vmem [thread:$0]  (!%p968_p8), %s188_s5, 512, %s190_s8, %s178_s4, %s736_s22, %s736_s22, %s737_s20  }
  0x46   : > { %p969_p0 = scmp.ne.s32.totalorder %s964_s26, 0 }
  0x47   : > { %s883_s19 = sand.u32 (!%p969_p0), 1, %s715_s13   ;;  %p970_p10 = scmp.ne.s32.totalorder (!%p969_p0), %s961_s23, 0 }
  0x48   : > { %201 = sbr.rel (%p969_p0) target bundleno = 307 (0x133), region = 32  ;;  %s445_s27 = sshll.u32 (!%p969_p0), %s883_s19, 5 }
  0x49   : > { %s204_s1 = scalar_lea.sflag (!%p969_p0), [#allocation3], %s883_s19  ;;  %s207_s30 = scalar_lea.vmem (!%p969_p0), [#allocation2], %s445_s27 }
  0x4d   : > { %698 = dma.done.wait (%p970_p10), %s204_s1, 512  }
  0x4e   : > { %700 = vsyncadd (%p970_p10), %s204_s1, 4294966784  ;;  %p971_p5 = scmp.ne.s32.totalorder %s959_s21, 0 }
  0x50   : > { %702 = dma.done.wait (%p971_p5), [#allocation6], 192  }
  0x51   : > { %704 = vsyncadd (%p971_p5), [#allocation6], 4294967104  ;;  %v738_v0 = vmov 0.0   ;;  %vm739_vm0 = vmmov 0   ;;  %v563_v1 = vld [vmem:[%s207_s30 + $0x18] sm:$0xff]   ;;  %v564_v2 = vld [vmem:[%s207_s30 + $0x10] sm:$0xff]  }
  0x52   : > { %464 = vmatprep.subr.bf16.mxu0 %v738_v0  ;;  %472 = vmatprep.mubr.msk.bf16.mxu0 %vm739_vm0, %v738_v0  ;;  %v565_v3 = vld [vmem:[%s207_s30 + $0x8] sm:$0xff]   ;;  %v566_v4 = vld [vmem:[%s207_s30] sm:$0xff]   ;;  %vm273_vm1 = vcmask 523264   ;;  %s448_s21 = sshll.u32 %s883_s19, 3  ;;  %s455_s23 = sshll.u32 %s723_s15, 7 }
  0x53   : > { %465 = vmatpush3.bf16.msra.mxu0 %v563_v1  ;;  %v239_v5 = vld [vmem:[#allocation5] sm:$0xf]  ;;  %v248_v6 = vld [vmem:[#allocation7] sm:$0xff]  ;;  %s237_s26 = scalar_lea.vmem [#allocation8], %s448_s21  ;;  %s900_s7 = scalar_lea.hbm %s951_s3, %s455_s23 }
  0x54   : > { %466 = vmatprep.subr.bf16.mxu0 %v738_v0  ;;  %s333_s29 = sshll.u32 %s237_s26, 4  ;;  %s319_s8 = scalar_lea.sflag [#allocation4], %s883_s19  ;;  %s902_s29 = int_to_ptr.vmem [resolvable:$true] %s333_s29 }
  0x55   : > { %s647_s4 = scalar_lea.vmem %s902_s29, 128  ;;  %p972_p7 = scmp.ne.s32.totalorder %s962_s24, 0 }
  0x56   : > { %p648_p3 = scmp.ne.s32.totalorder %s902_s29, %s647_s4  ;;  %s740_s15 = smov [#allocation8]  }
  0x57   : > { %467 = vmatpush3.bf16.msra.mxu0 %v564_v2  ;;  %s651_s10 = sshll.u32 %s740_s15, 4  ;;  %s652_s10 = int_to_ptr.vmem [resolvable:$false] %s651_s10 }
  0x58   : > { %468 = vmatprep.subr.bf16.mxu0 %v738_v0  ;;  %p649_p8 = pnand %p648_p3, %p972_p7  ;;  %s653_s11 = scalar_lea.vmem %s652_s10, 256 }
  0x59   : > { %p654_p12 = scmp.lt.s32.totalorder %s902_s29, %s652_s10  ;;  %p655_p13 = scmp.lt.s32.totalorder %s653_s11, %s647_s4 }
  0x5a   : > { %p650_p9 = pneg %p649_p8 }
  0x5b   : > { %469 = vmatpush3.bf16.msra.mxu0 %v565_v3  ;;  %p656_p4 = por %p655_p13, %p654_p12 }
  0x5c   : > { %470 = vmatprep.subr.bf16.mxu0 %v738_v0 }
  0x5d   : > { %p657_p2 = pnand %p656_p4, %p650_p9 }
  0x5f   : > { %471 = vmatpush3.bf16.msra.mxu0 %v566_v4 }
  0x62   : > { %473 = vmatmul.mubr.msk.bf16.vlgmr.msra.gmra.mxu0 %vm273_vm1, %v239_v5 }
 0x122   : > { %v311_v7 = vpop.f32.mrf.mxu0 }
 0x123   : > { %v312_v8 = vadd.f32 %v311_v7, %v248_v6 }
 0x124   : > { %v474_v9 = vpop.f32.mrf.mxu0 }
 0x125   : > { %317 = vst [vmem:[%s237_s26] sm:$0xff] %v312_v8 }
 0x126   : > { %v314_v10 = vpop.f32.mrf.mxu0 }
 0x127   : > { %660 = shalt.err (!%p657_p2)
}
 0x128   : > { %s661_s28 = scalar_lea.hbm %s900_s7, 128  ;;  %s665_s19 = scalar_lea.hbm %s951_s3, 256 }
 0x129   : > { %p662_p6 = scmp.ne.s32.totalorder %s900_s7, %s661_s28  ;;  %p666_p0 = scmp.lt.s32.totalorder %s900_s7, %s951_s3 }
 0x12a   : > { %p667_p10 = scmp.lt.s32.totalorder %s665_s19, %s661_s28 }
 0x12b   : > { %p663_p11 = pnand %p662_p6, %p972_p7 }
 0x12c   : > { %p668_p5 = por %p667_p10, %p666_p0 }
 0x12d   : > { %p664_p1 = pneg %p663_p11 }
 0x12f   : > { %p669_p3 = pnand %p668_p5, %p664_p1 }
 0x131   : > { %672 = shalt.err (!%p669_p3)
}
 0x132   : > { %486 = dma.vmem_to_hbm [thread:$0]  (%p972_p7), %s902_s29, 128, %s900_s7, %s319_s8   ;;  %v475_v11 = vpop.f32.mrf.mxu0 }
 0x133 PF: > { %s345_s30 = sand.u32 1, %s711_s12   ;;  %p973_p8 = scmp.ne.s32.totalorder %s963_s25, 0 }
 0x134   : > { %p974_p9 = scmp.ge.s32.totalorder %s731_s17, 2  ;;  %s346_s21 = scalar_lea.sflag [#allocation4], %s345_s30 }
 0x136   : > { %p500_p12 = pnand %p974_p9, %p973_p8 }
 0x138   : > { %p501_p13 = pneg %p500_p12 }
 0x13a   : > { %706 = dma.done.wait (%p501_p13), %s346_s21, 128  }
 0x13b   : > { %708 = vsyncadd (%p501_p13), %s346_s21, 4294967168  ;;  %s20_s17 = sadd.s32 1, %s731_s17   ;;  %s975_s12 = smov %s715_s13 }
 0x13c   : > { %p17_p4 = scmp.ge.s32.totalorder %s20_s17, 4   ;;  %s976_s13 = smov %s719_s14 }
 0x13d   : > { %s977_s14 = smov %s874_s9  ;;  %s978_s15 = smov %s727_s16 }
 0x13e   : > { %s979_s16 = smov %s981_s18  ;;  %19 = sbr.rel (!%p17_p4) target bundleno = 9 (0x9), region = 86 }
 0x143   :  { %351 = vsyncpa [#allocation3], 1 }
 0x144   :  { %353 = vsyncpa [#allocation3 + $0x1], 1 }
 0x145   :  { %354 = vsyncpa [#allocation6], 1 }
 0x146   :  { %355 = vsyncpa [#allocation4], 1 }
 0x147   :  { %357 = vsyncpa [#allocation4 + $0x1], 1 }

</bundles_post_ra>
